<compile_context>
chip_gen: v7x
topology: tpu7x:2x2x1
jax: 0.10.0
libtpu: 0.0.40
codegen_flags: <defaults>
</compile_context>

<pallas_src>
import functools

import jax
import jax.numpy as jnp
from jax.experimental import pallas as pl
from jax.experimental.pallas import tpu as pltpu


def _ae_head_kernel(w_ref, b_ref, x_ref, hms_ref, tms_ref):
    """One (batch, H*W-tile) block: both 1x1 convs as a single fused matmul.

    w_ref:   (KT, C)       fused weights (hms rows first, then tms rows)
    b_ref:   (KT, 1)       fused bias
    x_ref:   (C, tile_hw)  channels on sublanes, pixels on lanes (lane-dense)
    hms_ref: (K, tile_hw)
    tms_ref: (K*S, tile_hw)
    """
    num_keys = hms_ref.shape[0]
    out = jnp.dot(w_ref[...], x_ref[...],
                  preferred_element_type=jnp.float32) + b_ref[...]
    hms_ref[...] = out[:num_keys, :].astype(hms_ref.dtype)
    tms_ref[...] = out[num_keys:, :].astype(tms_ref.dtype)


def _pick_tile(hw, c, kt, vmem_budget_bytes=8 * 1024 * 1024):
    """Largest multiple-of-128 H*W tile whose double-buffered blocks fit VMEM."""
    # Per lane-column, f32: x block (C rows) + both output blocks (KT rows),
    # each double-buffered by the pipeline.
    bytes_per_lane = 4 * (c + kt) * 2
    tile = (vmem_budget_bytes // bytes_per_lane) // 128 * 128
    tile = int(max(128, min(tile, 4096)))
    if hw <= tile:
        return hw            # full-extent block is always a valid BlockSpec
    return tile


@functools.partial(jax.jit, static_argnames=("num_keys", "scale_res"))
def ae_head_forward(x, w_hms, b_hms, w_tms, b_tms, num_keys, scale_res):
    """x: NCHW float32 (or a list, like the PyTorch module). Weights (out, in).

    Returns ([heatmaps (B,K,H,W)], tagmaps (B,K,H,W,S)) matching the module.
    """
    if isinstance(x, (list, tuple)):
        x = x[0]

    B, C, H, W = x.shape
    K = num_keys
    S = scale_res
    KT = K + K * S
    HW = H * W

    # NCHW -> (B, C, H*W): free reshape, no HBM transpose of the big input.
    x_flat = x.reshape(B, C, HW)

    # Fuse the two 1x1 convs into one matmul (rows 0..K-1 = hms, rest = tms;
    # tms row ordering is c = k*S + s, identical to the conv output channels).
    w_fused = jnp.concatenate([w_hms, w_tms], axis=0)                 # (KT, C)
    b_fused = jnp.concatenate([b_hms, b_tms], axis=0).reshape(KT, 1)  # (KT, 1)

    tile = _pick_tile(HW, C, KT)
    grid = (B, pl.cdiv(HW, tile))

    hms_flat, tms_flat = pl.pallas_call(
        _ae_head_kernel,
        out_shape=(
            jax.ShapeDtypeStruct((B, K, HW), jnp.float32),
            jax.ShapeDtypeStruct((B, K * S, HW), jnp.float32),
        ),
        grid_spec=pltpu.PrefetchScalarGridSpec(
            num_scalar_prefetch=0,
            grid=grid,
            in_specs=[
                # Grid-invariant blocks: fetched once, resident in VMEM.
                pl.BlockSpec((KT, C), lambda b, j: (0, 0)),              # W
                pl.BlockSpec((KT, 1), lambda b, j: (0, 0)),              # bias
                pl.BlockSpec((None, C, tile), lambda b, j: (b, 0, j)),   # x
            ],
            out_specs=[
                pl.BlockSpec((None, K, tile), lambda b, j: (b, 0, j)),
                pl.BlockSpec((None, K * S, tile), lambda b, j: (b, 0, j)),
            ],
        ),
        compiler_params=pltpu.CompilerParams(
            dimension_semantics=("parallel", "parallel")),
    )(w_fused, b_fused, x_flat)

    # heatmaps: (B, K, H*W) -> (B, K, H, W): free reshape, no transpose.
    heatmaps = hms_flat.reshape(B, K, H, W)

    # tagmaps: (B, K*S, H*W) -> view (B, K, S, H, W) -> permute (0,1,3,4,2).
    # Only this small output tensor is permuted by XLA; the large x and the
    # in-kernel stores stay lane-dense.
    tagmaps = jnp.transpose(tms_flat.reshape(B, K, S, H, W), (0, 1, 3, 4, 2))

    return [heatmaps], tagmaps


def init_params(key, in_channels, num_keys, scale_res):
    """Deterministic init matching nn.init.normal_(std=0.001), bias = 0.

    Weights stored PyTorch-conv style: (out_channels, in_channels).
    """
    k1, k2 = jax.random.split(key)
    w_hms = (jax.random.normal(k1, (num_keys, in_channels), jnp.float32)
             * 0.001)
    b_hms = jnp.zeros((num_keys,), jnp.float32)
    w_tms = (jax.random.normal(k2, (num_keys * scale_res, in_channels),
                               jnp.float32) * 0.001)
    b_tms = jnp.zeros((num_keys * scale_res,), jnp.float32)
    return w_hms, b_hms, w_tms, b_tms


if __name__ == "__main__":
    B, C, H, W = 2, 4, 16, 16
    num_keys, scale_res = 8, 2

    key = jax.random.PRNGKey(0)
    kx, kp = jax.random.split(key)
    x = jax.random.normal(kx, (B, C, H, W), jnp.float32)

    w_hms, b_hms, w_tms, b_tms = init_params(kp, C, num_keys, scale_res)

    (heatmaps,), tagmaps = ae_head_forward(
        x, w_hms, b_hms, w_tms, b_tms, num_keys, scale_res)

    jax.block_until_ready(heatmaps)
    jax.block_until_ready(tagmaps)

    # Pure-JAX reference of the same math (PyTorch conv semantics).
    hms_ref = (jnp.einsum("kc,bchw->bkhw", w_hms, x)
               + b_hms[None, :, None, None])
    tms_conv = (jnp.einsum("oc,bchw->bohw", w_tms, x)
                + b_tms[None, :, None, None])
    tms_ref = jnp.transpose(
        tms_conv.reshape(B, num_keys, scale_res, H, W), (0, 1, 3, 4, 2))

    assert heatmaps.shape == (B, num_keys, H, W)
    assert tagmaps.shape == (B, num_keys, H, W, scale_res)
    assert jnp.allclose(heatmaps, hms_ref, atol=1e-5)
    assert jnp.allclose(tagmaps, tms_ref, atol=1e-5)

    print("KERNEL_OK")
</pallas_src>

<mosaic_0001>
module attributes {stable_mosaic.version = 11 : i64} {
  func.func @_ae_head_kernel(%arg0: i32, %arg1: i32, %arg2: memref<24x4xf32, #tpu.memory_space<vmem>>, %arg3: memref<24x1xf32, #tpu.memory_space<vmem>>, %arg4: memref<1x4x256xf32, #tpu.memory_space<vmem>>, %arg5: memref<1x8x256xf32, #tpu.memory_space<vmem>>, %arg6: memref<1x16x256xf32, #tpu.memory_space<vmem>>) attributes {dimension_semantics = [#tpu.dimension_semantics<parallel>, #tpu.dimension_semantics<parallel>], iteration_bounds = array<i64: 2, 1>, scalar_prefetch = 0 : i64, scratch_operands = 0 : i64, tpu.core_type = #tpu.core_type<tc>, window_params = [{pipeline_mode = #tpu.pipeline_mode<synchronous>, transform_indices = @transform_0, window_bounds = array<i64: 24, 4>}, {pipeline_mode = #tpu.pipeline_mode<synchronous>, transform_indices = @transform_1, window_bounds = array<i64: 24, 1>}, {transform_indices = @transform_2, window_bounds = array<i64: 1, 4, 256>}, {transform_indices = @transform_3, window_bounds = array<i64: 1, 8, 256>}, {transform_indices = @transform_4, window_bounds = array<i64: 1, 16, 256>}]} {
    %c0 = arith.constant 0 : index
    %c0_0 = arith.constant 0 : index
    %0 = vector.load %arg2[%c0, %c0_0] : memref<24x4xf32, #tpu.memory_space<vmem>>, vector<24x4xf32>
    %c0_1 = arith.constant 0 : index
    %c0_2 = arith.constant 0 : index
    %c0_3 = arith.constant 0 : index
    %1 = vector.load %arg4[%c0_1, %c0_2, %c0_3] : memref<1x4x256xf32, #tpu.memory_space<vmem>>, vector<1x4x256xf32>
    %2 = vector.shape_cast %1 : vector<1x4x256xf32> to vector<4x256xf32>
    %cst = arith.constant dense<0.000000e+00> : vector<24x256xf32>
    %3 = tpu.matmul %0, %2, %cst {dimension_numbers = #tpu.dot_dimension_numbers<[1], [0], [0], [1], [0, 0, 1, 1], [], []>} : vector<24x4xf32>, vector<4x256xf32>, vector<24x256xf32> -> vector<24x256xf32>
    %c0_4 = arith.constant 0 : index
    %c0_5 = arith.constant 0 : index
    %4 = vector.load %arg3[%c0_4, %c0_5] : memref<24x1xf32, #tpu.memory_space<vmem>>, vector<24x1xf32>
    %5 = vector.broadcast %4 : vector<24x1xf32> to vector<24x256xf32>
    %6 = arith.addf %3, %5 : vector<24x256xf32>
    %7 = vector.extract_strided_slice %6 {offsets = [0, 0], sizes = [8, 256], strides = [1, 1]} : vector<24x256xf32> to vector<8x256xf32>
    %c0_6 = arith.constant 0 : index
    %c0_7 = arith.constant 0 : index
    %c0_8 = arith.constant 0 : index
    %8 = vector.load %arg5[%c0_6, %c0_7, %c0_8] : memref<1x8x256xf32, #tpu.memory_space<vmem>>, vector<1x8x256xf32>
    %9 = vector.shape_cast %8 : vector<1x8x256xf32> to vector<8x256xf32>
    %10 = vector.shape_cast %7 : vector<8x256xf32> to vector<1x8x256xf32>
    tpu.vector_store %arg5[%c0_6, %c0_7, %c0_8], %10 {strides = array<i32>} : memref<1x8x256xf32, #tpu.memory_space<vmem>>, vector<1x8x256xf32>,
    %11 = vector.extract_strided_slice %6 {offsets = [8, 0], sizes = [16, 256], strides = [1, 1]} : vector<24x256xf32> to vector<16x256xf32>
    %c0_9 = arith.constant 0 : index
    %c0_10 = arith.constant 0 : index
    %c0_11 = arith.constant 0 : index
    %12 = vector.load %arg6[%c0_9, %c0_10, %c0_11] : memref<1x16x256xf32, #tpu.memory_space<vmem>>, vector<1x16x256xf32>
    %13 = vector.shape_cast %12 : vector<1x16x256xf32> to vector<16x256xf32>
    %14 = vector.shape_cast %11 : vector<16x256xf32> to vector<1x16x256xf32>
    tpu.vector_store %arg6[%c0_9, %c0_10, %c0_11], %14 {strides = array<i32>} : memref<1x16x256xf32, #tpu.memory_space<vmem>>, vector<1x16x256xf32>,
    return
  }
  func.func @transform_0(%arg0: i32, %arg1: i32) -> (i32, i32) {
    %c0_i32 = arith.constant 0 : i32
    %c0_i32_0 = arith.constant 0 : i32
    %c0_i32_1 = arith.constant 0 : i32
    return %c0_i32, %c0_i32_0 : i32, i32
  }
  func.func @transform_1(%arg0: i32, %arg1: i32) -> (i32, i32) {
    %c0_i32 = arith.constant 0 : i32
    %c0_i32_0 = arith.constant 0 : i32
    %c0_i32_1 = arith.constant 0 : i32
    return %c0_i32, %c0_i32_0 : i32, i32
  }
  func.func @transform_2(%arg0: i32, %arg1: i32) -> (i32, i32, i32) {
    %c0_i32 = arith.constant 0 : i32
    %c0_i32_0 = arith.constant 0 : i32
    return %arg0, %c0_i32, %arg1 : i32, i32, i32
  }
  func.func @transform_3(%arg0: i32, %arg1: i32) -> (i32, i32, i32) {
    %c0_i32 = arith.constant 0 : i32
    %c0_i32_0 = arith.constant 0 : i32
    return %arg0, %c0_i32, %arg1 : i32, i32, i32
  }
  func.func @transform_4(%arg0: i32, %arg1: i32) -> (i32, i32, i32) {
    %c0_i32 = arith.constant 0 : i32
    %c0_i32_0 = arith.constant 0 : i32
    return %arg0, %c0_i32, %arg1 : i32, i32, i32
  }
}

</mosaic_0001>

<bundles_post_ra>
// kernel: ae_head_forward.1
= control target key start
LH: loop header
LB: loop body
LE: loop exit
PB: predicated region body
PF: predicated region fallthrough
CT: control target
= control target key end

     0   :  { %s629_s15 = smov 0   ;;  %s631_s16 = smov 0   ;;  %s688_s0 = inlined_call_operand.vmem [shape: f32[24,4], index: 0, kind: input, shape index: {}]   ;;  %s689_s1 = inlined_call_operand.vmem [shape: f32[24,1], index: 1, kind: input, shape index: {}]   ;;  %s690_s2 = inlined_call_operand.vmem [shape: f32[2,4,256], index: 2, kind: input, shape index: {}]   ;;  %s691_s3 = inlined_call_operand.vmem [shape: f32[2,8,256], index: 3, kind: output, shape index: {0}]   ;;  %s692_s4 = inlined_call_operand.vmem [shape: f32[2,16,256], index: 4, kind: output, shape index: {1}]  }
   0x1   :  { %s633_s17 = smov 0  }
   0x2 LB: > { %s27_s18 = sadd.s32 1, %s596_s16  ;;  %p530_p0 = scmp.ge.s32.totalorder %s600_s17, 1  ;;  %s600_s17 = sphi %s633_s17, %s15_s17   ;;  %s596_s16 = sphi %s631_s16, %s694_s16   ;;  %s592_s15 = sphi %s629_s15, %s693_s15  }
   0x3   : > { %p29_p1 = scmp.ge.s32.totalorder %s27_s18, 2  ;;  %p188_p2 = scmp.lt.s32.totalorder %s600_s17, 3 }
   0x5   : > { %s696_s18 = smov (%p29_p1, %s27_s18), 0  ;;  %p189_p3 = pnand %p530_p0, %p188_p2 }
   0x6   : > { %p232_p4 = scmp.lt.s32.totalorder (!%p189_p3), %s592_s15, 1  ;;  %v602_v0 = vmov (!%p189_p3), 0.0   ;;  %v265_v1 = vld [vmem:[%s689_s1] sm:$0xff] (!%p189_p3)  ;;  %v603_v2 = vmov (!%p189_p3), 0   ;;  %v267_v3 = vld [vmem:[%s689_s1 + $0x10] sm:$0xff] (!%p189_p3)  ;;  %v266_v4 = vld [vmem:[%s689_s1 + $0x8] sm:$0xff] (!%p189_p3) }
   0x7   : > { %192 = sbr.rel (%p189_p3) target bundleno = 242 (0xf2), region = 32  ;;  %364 = vmatprep.mubr.f32.mxu0 (!%p189_p3), %v602_v0  ;;  %370 = vmatprep.mubr.f32.mxu1 (!%p189_p3), %v602_v0  ;;  %vm295_vm0 = vcmask (!%p189_p3), 1043456   ;;  %v261_v7 = vld [vmem:[%s688_s0] sm:$0xff] (!%p189_p3)  ;;  %vm285_vm1 = vcmask (!%p189_p3), 31744   ;;  %v262_v8 = vld [vmem:[%s688_s0 + $0x8] sm:$0xff] (!%p189_p3)  ;;  %v263_v9 = vld [vmem:[%s688_s0 + $0x10] sm:$0xff] (!%p189_p3) }
   0x8   : > { %575 = vset.pattern.permute.xlu0 (!%p189_p3), %v603_v2  ;;  %576 = vset.pattern.permute.xlu1 (!%p189_p3), %v603_v2 }
   0x9   : > { %270 = vperm.xlu0 (!%p189_p3), %575, %v265_v1   ;;  %280 = vperm.xlu1 (!%p189_p3), %576, %v267_v3  }
   0xd   : > { %275 = vperm.xlu0 (!%p189_p3), %575, %v266_v4  }
   0xe   : > { %s698_s15 = smov (!%p232_p4, %s592_s15), 1 }
   0xf   : > { %s544_s23 = sshll.u32 %s698_s15, 3  ;;  %s545_s9 = sshll.u32 %s698_s15, 4 }
  0x10   : > { %s239_s28 = scalar_lea.vmem %s690_s2, %s544_s23  ;;  %s546_s10 = sshll.u32 %s698_s15, 5 }
  0x11   : > { %v264_v5 = vld [vmem:[%s239_s28] sm:$0xff]  ;;  %s249_s13 = scalar_lea.vmem %s691_s3, %s545_s9  ;;  %s259_s20 = scalar_lea.vmem %s692_s4, %s546_s10 }
  0x12   : > { %v284_v6 = vcombine.high %v264_v5, %v264_v5 }
  0x14   : > { %537 = vmatprep.subr.msk.mxu0 %vm295_vm0, %v284_v6  ;;  %547 = vmatprep.subr.msk.mxu1 %vm295_vm0, %v284_v6 }
  0x15   : > { %538 = vmatpush1.msk.msra.mxu0 %vm295_vm0, %v264_v5  ;;  %548 = vmatpush1.msk.msra.mxu1 %vm295_vm0, %v264_v5 }
  0x16   : > { %539 = vmatmul.mubr.msk.f32.vlgmr.msra.gmra.mrb[0].mxu0 %vm285_vm1, %v261_v7  ;;  %540 = vmatmul.mubr.msk.f32.vlgmr.msra.gmra.mrb[0].mxu1 %vm285_vm1, %v262_v8 }
  0x17   : > { %376 = vmatprep.mubr.f32.mxu1 %v602_v0 }
  0x1a   : > { %541 = vmatmul.mubr.msk.f32.gmra.mrb[2].mxu1 %vm285_vm1, %v263_v9 }
  0x88   : > { %v271_v10 = vpop.permute.xlu0 %270  ;;  %v281_v20 = vpop.permute.xlu1 %280 }
  0x8c   : > { %v276_v11 = vpop.permute.xlu0 %275 }
  0xe9   : > { %v366_v12 = vpop.f32.mrb[0].mxu0  ;;  %v372_v13 = vpop.f32.mrb[0].mxu1 }
  0xea   : > { %v367_v14 = vadd.f32 %v366_v12, %v271_v10  ;;  %v373_v15 = vadd.f32 %v372_v13, %v276_v11  ;;  %v368_v16 = vpop.f32.mrb[1].mxu0  ;;  %v374_v17 = vpop.f32.mrb[1].mxu1 }
  0xeb   : > { %v369_v18 = vadd.f32 %v368_v16, %v271_v10  ;;  %v375_v19 = vadd.f32 %v374_v17, %v276_v11 }
  0xec   : > { %383 = vst [vmem:[%s249_s13] sm:$0xff] %v367_v14  ;;  %385 = vst [vmem:[%s259_s20] sm:$0xff] %v373_v15 }
  0xed   : > { %384 = vst [vmem:[%s249_s13 + $0x8] sm:$0xff] %v369_v18  ;;  %386 = vst [vmem:[%s259_s20 + $0x8] sm:$0xff] %v375_v19  ;;  %v378_v21 = vpop.f32.mrb[2].mxu1 }
  0xee   : > { %v379_v22 = vadd.f32 %v378_v21, %v281_v20  ;;  %v380_v23 = vpop.f32.mrb[3].mxu1 }
  0xef   : > { %v381_v24 = vadd.f32 %v380_v23, %v281_v20 }
  0xf0   : > { %387 = vst [vmem:[%s259_s20 + $0x10] sm:$0xff] %v379_v22 }
  0xf1   : > { %388 = vst [vmem:[%s259_s20 + $0x18] sm:$0xff] %v381_v24 }
  0xf2 PF: > { %s15_s17 = sadd.s32 1, %s600_s17   ;;  %s693_s15 = smov %s596_s16 }
  0xf3   : > { %p12_p5 = scmp.ge.s32.totalorder %s15_s17, 4   ;;  %s694_s16 = smov %s696_s18 }
  0xf5   :  { %14 = sbr.rel (!%p12_p5) target bundleno = 2 (0x2), region = 74 }

</bundles_post_ra>
